<compile_context>
chip_gen: v7x
topology: tpu7x:2x2x1
jax: 0.10.0
libtpu: 0.0.40
codegen_flags: <defaults>
</compile_context>

<pallas_src>
import functools

import jax
import jax.numpy as jnp
from jax.experimental import pallas as pl
from jax.experimental.pallas import tpu as pltpu

HIDDEN = 128


def _round_up(x, m):
    return ((x + m - 1) // m) * m


def _chip_kind():
    """Coarse chip classification for tile-size / kernel-variant selection."""
    try:
        kind = jax.devices()[0].device_kind.lower()
    except Exception:  # pragma: no cover - defensive
        return "unknown"
    if "v5 lite" in kind or "v5lite" in kind or "v5e" in kind:
        return "v5e"
    if "v6" in kind:
        return "v6e"
    if "v7" in kind:
        return "v7x"
    return "unknown"


def _select_tile(b, chip, block_b):
    """Pick (tile_rows, num_tiles) for the batch axis."""
    b8 = _round_up(max(b, 1), 8)
    if block_b is not None:
        tb = _round_up(min(block_b, b8), 8)
        return tb, pl.cdiv(b8, tb)
    if chip == "v5e":
        cap, cores = 512, 1      # near compute-bound; bigger tiles gain little
    elif chip == "v6e":
        cap, cores = 2048, 1     # amortize ~0.35us/step overhead
    else:                        # v7x / unknown: 2 TCs, 3.2 TB/s HBM
        cap, cores = 4096, 2
    n = pl.cdiv(b8, cap)
    if cores > 1 and b8 > 1024:
        # Keep num_tiles a multiple of the core count so both TCs get work.
        n = _round_up(max(n, cores), cores)
    tb = _round_up(pl.cdiv(b8, n), 8)
    return tb, pl.cdiv(b8, tb)


# ----------------------------------------------------------------------------
# Kernels.  Both variants take the SAME operand set:
#   x_ref  : (TB, 3L)    f32   packed [label_set | current_label | count_so_far]
#   w1_ref : (3L, 384)   bf16  block-diagonal fc1 weights (in, out)
#   w2_ref : (384, 384)  bf16  block-diagonal fc2 weights (in, out)
#   wf_ref : (384, 128)  bf16  final fc weight (in, out)
#   b1_ref : (1, 384)    f32   concatenated fc1 biases
#   b2_ref : (1, 384)    f32   concatenated fc2 biases
#   bf_ref : (1, 128)    f32   final fc bias
#   out_ref: (TB, 128)
# ----------------------------------------------------------------------------


def _kernel_blockdiag(x_ref, w1_ref, w2_ref, wf_ref, b1_ref, b2_ref, bf_ref,
                      out_ref):
    """v6e/v7x variant: three full-width MXU contractions, zero vector copies."""
    h = jnp.dot(x_ref[...].astype(jnp.bfloat16), w1_ref[...],
                preferred_element_type=jnp.float32)
    h = jnp.maximum(h + b1_ref[...], 0.0)                       # (TB, 384)
    h = jnp.dot(h.astype(jnp.bfloat16), w2_ref[...],
                preferred_element_type=jnp.float32)
    h = jnp.maximum(h + b2_ref[...], 0.0)                       # (TB, 384)
    out = jnp.dot(h.astype(jnp.bfloat16), wf_ref[...],
                  preferred_element_type=jnp.float32)
    out_ref[...] = (out + bf_ref[...]).astype(out_ref.dtype)


def _kernel_split(x_ref, w1_ref, w2_ref, wf_ref, b1_ref, b2_ref, bf_ref,
                  out_ref):
    """v5e variant: fused fc1, but per-encoder (128x128) fc2 + sum-of-dots fc
    (no FLOP inflation on the compute-bound 128-wide MXUs, still no concat)."""
    h1 = jnp.dot(x_ref[...].astype(jnp.bfloat16), w1_ref[...],
                 preferred_element_type=jnp.float32)
    h1 = jnp.maximum(h1 + b1_ref[...], 0.0)                     # (TB, 384)

    agg = jnp.zeros((out_ref.shape[0], HIDDEN), jnp.float32)
    for k in range(3):                                          # static unroll
        sl = slice(k * HIDDEN, (k + 1) * HIDDEN)
        h2 = jnp.dot(h1[:, sl].astype(jnp.bfloat16), w2_ref[sl, sl],
                     preferred_element_type=jnp.float32)
        h2 = jnp.maximum(h2 + b2_ref[:, sl], 0.0)
        agg = agg + jnp.dot(h2.astype(jnp.bfloat16), wf_ref[sl, :],
                            preferred_element_type=jnp.float32)
    out_ref[...] = (agg + bf_ref[...]).astype(out_ref.dtype)


# ----------------------------------------------------------------------------
# Parameter packing (one-time, hoisted out of the per-call path).
# ----------------------------------------------------------------------------


def prepare_params(params):
    """Repack PyTorch-shaped tensors (weights (out,in), biases (out,)) into the
    block-diagonal layout consumed by both kernel variants."""
    bd = jax.scipy.linalg.block_diag
    w1 = bd(params["ls.fc1.w"].T, params["sl.fc1.w"].T,
            params["ct.fc1.w"].T).astype(jnp.bfloat16)            # (3L, 384)
    w2 = bd(params["ls.fc2.w"].T, params["sl.fc2.w"].T,
            params["ct.fc2.w"].T).astype(jnp.bfloat16)            # (384, 384)
    wf = params["fc.w"].T.astype(jnp.bfloat16)                    # (384, 128)
    b1 = jnp.concatenate([params["ls.fc1.b"], params["sl.fc1.b"],
                          params["ct.fc1.b"]]).astype(jnp.float32)[None, :]
    b2 = jnp.concatenate([params["ls.fc2.b"], params["sl.fc2.b"],
                          params["ct.fc2.b"]]).astype(jnp.float32)[None, :]
    bf = params["fc.b"].astype(jnp.float32)[None, :]
    return {"w1": w1, "w2": w2, "wf": wf, "b1": b1, "b2": b2, "bf": bf}


def _xla_forward(x_packed, prepared, out_dtype):
    """Small-batch fallback: same math, plain XLA (no pallas launch overhead)."""
    h = jnp.maximum(
        jnp.dot(x_packed.astype(jnp.bfloat16), prepared["w1"],
                preferred_element_type=jnp.float32) + prepared["b1"], 0.0)
    h = jnp.maximum(
        jnp.dot(h.astype(jnp.bfloat16), prepared["w2"],
                preferred_element_type=jnp.float32) + prepared["b2"], 0.0)
    out = jnp.dot(h.astype(jnp.bfloat16), prepared["wf"],
                  preferred_element_type=jnp.float32) + prepared["bf"]
    return out.astype(out_dtype)


# ----------------------------------------------------------------------------
# Public forward.
# ----------------------------------------------------------------------------


def count_conditioning_mlp(label_set, current_label, count_so_far, prepared,
                           *, block_b=None, out_dtype=jnp.float32,
                           use_pallas=None):
    """Fused forward pass.  `prepared` comes from prepare_params()."""
    B, L = label_set.shape
    assert current_label.shape == (B, L) and count_so_far.shape == (B, L)
    L3 = 3 * L
    assert prepared["w1"].shape == (L3, 3 * HIDDEN)

    # Pack the three inputs into one (B, 3L) stream (one DMA per grid step).
    x = jnp.concatenate([label_set, current_label, count_so_far], axis=-1)
    x = x.astype(jnp.float32)

    if use_pallas is None:
        use_pallas = B >= 256
    if not use_pallas:
        return _xla_forward(x, prepared, out_dtype)

    chip = _chip_kind()
    tb, num_tiles = _select_tile(B, chip, block_b)
    b_pad = num_tiles * tb
    if b_pad != B:
        x = jnp.pad(x, ((0, b_pad - B), (0, 0)))   # single pad on packed input

    kernel = _kernel_split if chip == "v5e" else _kernel_blockdiag

    # Advisory cost estimate so XLA can overlap this latency-class kernel.
    if chip == "v5e":
        flops_per_row = 2 * (L3 * 3 * HIDDEN + 3 * HIDDEN * HIDDEN
                             + 3 * HIDDEN * HIDDEN)
    else:
        flops_per_row = 2 * (L3 * 3 * HIDDEN + (3 * HIDDEN) ** 2
                             + 3 * HIDDEN * HIDDEN)
    weight_bytes = sum(int(v.size) * v.dtype.itemsize for v in prepared.values())
    cost = pl.CostEstimate(
        flops=flops_per_row * b_pad,
        transcendentals=0,
        bytes_accessed=b_pad * L3 * 4
        + b_pad * HIDDEN * jnp.dtype(out_dtype).itemsize
        + weight_bytes)

    const2d = lambda i: (0, 0)
    out = pl.pallas_call(
        kernel,
        out_shape=jax.ShapeDtypeStruct((b_pad, HIDDEN), out_dtype),
        grid=(num_tiles,),
        in_specs=[
            pl.BlockSpec((tb, L3), lambda i: (i, 0)),      # packed activations
            pl.BlockSpec(prepared["w1"].shape, const2d),   # VMEM-resident params
            pl.BlockSpec(prepared["w2"].shape, const2d),
            pl.BlockSpec(prepared["wf"].shape, const2d),
            pl.BlockSpec(prepared["b1"].shape, const2d),
            pl.BlockSpec(prepared["b2"].shape, const2d),
            pl.BlockSpec(prepared["bf"].shape, const2d),
        ],
        out_specs=pl.BlockSpec((tb, HIDDEN), lambda i: (i, 0)),
        compiler_params=pltpu.CompilerParams(
            dimension_semantics=("parallel",)),
        cost_estimate=cost,
    )(x, prepared["w1"], prepared["w2"], prepared["wf"],
      prepared["b1"], prepared["b2"], prepared["bf"])

    return out[:B] if b_pad != B else out


# ----------------------------------------------------------------------------
# Synthetic params + pure-JAX reference (mirrors the PyTorch forward).
# ----------------------------------------------------------------------------


def make_params(number_labels, key):
    names_shapes = {
        "ls.fc1.w": (HIDDEN, number_labels), "ls.fc1.b": (HIDDEN,),
        "ls.fc2.w": (HIDDEN, HIDDEN),        "ls.fc2.b": (HIDDEN,),
        "sl.fc1.w": (HIDDEN, number_labels), "sl.fc1.b": (HIDDEN,),
        "sl.fc2.w": (HIDDEN, HIDDEN),        "sl.fc2.b": (HIDDEN,),
        "ct.fc1.w": (HIDDEN, number_labels), "ct.fc1.b": (HIDDEN,),
        "ct.fc2.w": (HIDDEN, HIDDEN),        "ct.fc2.b": (HIDDEN,),
        "fc.w": (HIDDEN, 3 * HIDDEN),        "fc.b": (HIDDEN,),
    }
    params = {}
    for i, (name, shape) in enumerate(sorted(names_shapes.items())):
        k = jax.random.fold_in(key, i)
        params[name] = 0.05 * jax.random.normal(k, shape, dtype=jnp.float32)
    return params


def reference(label_set, current_label, count_so_far, params):
    def enc(x, p):
        x = jax.nn.relu(x @ params[p + ".fc1.w"].T + params[p + ".fc1.b"])
        x = jax.nn.relu(x @ params[p + ".fc2.w"].T + params[p + ".fc2.b"])
        return x
    agg = jnp.concatenate(
        [enc(label_set, "ls"), enc(current_label, "sl"), enc(count_so_far, "ct")],
        axis=-1)
    return agg @ params["fc.w"].T + params["fc.b"]


if __name__ == "__main__":
    NUMBER_LABELS = 8
    key = jax.random.PRNGKey(0)
    k_ls, k_cl, k_cs, k_p, k2 = jax.random.split(key, 5)

    params = make_params(NUMBER_LABELS, k_p)
    prepared = prepare_params(params)        # one-time repacking

    # --- tiny batch (B=2), Pallas path forced so the kernel is exercised ---
    B = 2
    label_set = jax.random.uniform(k_ls, (B, NUMBER_LABELS), dtype=jnp.float32)
    current_label = jax.nn.one_hot(
        jax.random.randint(k_cl, (B,), 0, NUMBER_LABELS), NUMBER_LABELS,
        dtype=jnp.float32)
    count_so_far = jax.random.uniform(k_cs, (B, NUMBER_LABELS), dtype=jnp.float32)

    out = count_conditioning_mlp(label_set, current_label, count_so_far,
                                 prepared, use_pallas=True)
    out = jax.block_until_ready(out)
    ref = reference(label_set, current_label, count_so_far, params)
    assert out.shape == (B, HIDDEN)
    # bf16 MXU inputs (f32 accumulation) -> loosened tolerance vs pure-f32 ref.
    err = float(jnp.max(jnp.abs(out - ref)))
    assert jnp.allclose(out, ref, atol=2e-2, rtol=2e-2), err

    # --- multi-tile batch to exercise the pipelined grid on all chips ---
    B2 = 1024
    k_a, k_b, k_c = jax.random.split(k2, 3)
    ls2 = jax.random.uniform(k_a, (B2, NUMBER_LABELS), dtype=jnp.float32)
    cl2 = jax.nn.one_hot(
        jax.random.randint(k_b, (B2,), 0, NUMBER_LABELS), NUMBER_LABELS,
        dtype=jnp.float32)
    cs2 = jax.random.uniform(k_c, (B2, NUMBER_LABELS), dtype=jnp.float32)

    out2 = count_conditioning_mlp(ls2, cl2, cs2, prepared, block_b=256)
    out2 = jax.block_until_ready(out2)
    ref2 = reference(ls2, cl2, cs2, params)
    assert out2.shape == (B2, HIDDEN)
    err2 = float(jnp.max(jnp.abs(out2 - ref2)))
    assert jnp.allclose(out2, ref2, atol=2e-2, rtol=2e-2), err2

    print("KERNEL_OK")
</pallas_src>

<mosaic_0001>
module attributes {stable_mosaic.version = 11 : i64} {
  func.func @_kernel_blockdiag(%arg0: i32, %arg1: memref<8x24xf32, #tpu.memory_space<vmem>>, %arg2: memref<24x384xbf16, #tpu.memory_space<vmem>>, %arg3: memref<384x384xbf16, #tpu.memory_space<vmem>>, %arg4: memref<384x128xbf16, #tpu.memory_space<vmem>>, %arg5: memref<1x384xf32, #tpu.memory_space<vmem>>, %arg6: memref<1x384xf32, #tpu.memory_space<vmem>>, %arg7: memref<1x128xf32, #tpu.memory_space<vmem>>, %arg8: memref<8x128xf32, #tpu.memory_space<vmem>>) attributes {dimension_semantics = [#tpu.dimension_semantics<parallel>], iteration_bounds = array<i64: 1>, scalar_prefetch = 0 : i64, scratch_operands = 0 : i64, tpu.core_type = #tpu.core_type<tc>, window_params = [{transform_indices = @transform_0, window_bounds = array<i64: 8, 24>}, {pipeline_mode = #tpu.pipeline_mode<synchronous>, transform_indices = @transform_1, window_bounds = array<i64: 24, 384>}, {pipeline_mode = #tpu.pipeline_mode<synchronous>, transform_indices = @transform_2, window_bounds = array<i64: 384, 384>}, {pipeline_mode = #tpu.pipeline_mode<synchronous>, transform_indices = @transform_3, window_bounds = array<i64: 384, 128>}, {pipeline_mode = #tpu.pipeline_mode<synchronous>, transform_indices = @transform_4, window_bounds = array<i64: 1, 384>}, {pipeline_mode = #tpu.pipeline_mode<synchronous>, transform_indices = @transform_5, window_bounds = array<i64: 1, 384>}, {pipeline_mode = #tpu.pipeline_mode<synchronous>, transform_indices = @transform_6, window_bounds = array<i64: 1, 128>}, {transform_indices = @transform_7, window_bounds = array<i64: 8, 128>}]} {
    %c0 = arith.constant 0 : index
    %c0_0 = arith.constant 0 : index
    %0 = vector.load %arg1[%c0, %c0_0] : memref<8x24xf32, #tpu.memory_space<vmem>>, vector<8x24xf32>
    %1 = arith.truncf %0 : vector<8x24xf32> to vector<8x24xbf16>
    %c0_1 = arith.constant 0 : index
    %c0_2 = arith.constant 0 : index
    %2 = vector.load %arg2[%c0_1, %c0_2] : memref<24x384xbf16, #tpu.memory_space<vmem>>, vector<24x384xbf16>
    %cst = arith.constant dense<0.000000e+00> : vector<8x384xf32>
    %3 = tpu.matmul %1, %2, %cst {dimension_numbers = #tpu.dot_dimension_numbers<[1], [0], [0], [1], [0, 0, 1, 1], [], []>} : vector<8x24xbf16>, vector<24x384xbf16>, vector<8x384xf32> -> vector<8x384xf32>
    %c0_3 = arith.constant 0 : index
    %c0_4 = arith.constant 0 : index
    %4 = vector.load %arg5[%c0_3, %c0_4] : memref<1x384xf32, #tpu.memory_space<vmem>>, vector<1x384xf32>
    %5 = vector.broadcast %4 : vector<1x384xf32> to vector<8x384xf32>
    %6 = arith.addf %3, %5 : vector<8x384xf32>
    %cst_5 = arith.constant 0.000000e+00 : f32
    %7 = vector.broadcast %cst_5 : f32 to vector<8x384xf32>
    %8 = arith.maximumf %6, %7 : vector<8x384xf32>
    %9 = arith.truncf %8 : vector<8x384xf32> to vector<8x384xbf16>
    %c0_6 = arith.constant 0 : index
    %c0_7 = arith.constant 0 : index
    %10 = vector.load %arg3[%c0_6, %c0_7] : memref<384x384xbf16, #tpu.memory_space<vmem>>, vector<384x384xbf16>
    %cst_8 = arith.constant dense<0.000000e+00> : vector<8x384xf32>
    %11 = tpu.matmul %9, %10, %cst_8 {dimension_numbers = #tpu.dot_dimension_numbers<[1], [0], [0], [1], [0, 0, 1, 1], [], []>} : vector<8x384xbf16>, vector<384x384xbf16>, vector<8x384xf32> -> vector<8x384xf32>
    %c0_9 = arith.constant 0 : index
    %c0_10 = arith.constant 0 : index
    %12 = vector.load %arg6[%c0_9, %c0_10] : memref<1x384xf32, #tpu.memory_space<vmem>>, vector<1x384xf32>
    %13 = vector.broadcast %12 : vector<1x384xf32> to vector<8x384xf32>
    %14 = arith.addf %11, %13 : vector<8x384xf32>
    %cst_11 = arith.constant 0.000000e+00 : f32
    %15 = vector.broadcast %cst_11 : f32 to vector<8x384xf32>
    %16 = arith.maximumf %14, %15 : vector<8x384xf32>
    %17 = arith.truncf %16 : vector<8x384xf32> to vector<8x384xbf16>
    %c0_12 = arith.constant 0 : index
    %c0_13 = arith.constant 0 : index
    %18 = vector.load %arg4[%c0_12, %c0_13] : memref<384x128xbf16, #tpu.memory_space<vmem>>, vector<384x128xbf16>
    %cst_14 = arith.constant dense<0.000000e+00> : vector<8x128xf32>
    %19 = tpu.matmul %17, %18, %cst_14 {dimension_numbers = #tpu.dot_dimension_numbers<[1], [0], [0], [1], [0, 0, 1, 1], [], []>} : vector<8x384xbf16>, vector<384x128xbf16>, vector<8x128xf32> -> vector<8x128xf32>
    %c0_15 = arith.constant 0 : index
    %c0_16 = arith.constant 0 : index
    %20 = vector.load %arg7[%c0_15, %c0_16] : memref<1x128xf32, #tpu.memory_space<vmem>>, vector<1x128xf32>
    %21 = vector.broadcast %20 : vector<1x128xf32> to vector<8x128xf32>
    %22 = arith.addf %19, %21 : vector<8x128xf32>
    %c0_17 = arith.constant 0 : index
    %c0_18 = arith.constant 0 : index
    %23 = vector.load %arg8[%c0_17, %c0_18] : memref<8x128xf32, #tpu.memory_space<vmem>>, vector<8x128xf32>
    tpu.vector_store %arg8[%c0_17, %c0_18], %22 {strides = array<i32>} : memref<8x128xf32, #tpu.memory_space<vmem>>, vector<8x128xf32>,
    return
  }
  func.func @transform_0(%arg0: i32) -> (i32, i32) {
    %c0_i32 = arith.constant 0 : i32
    %c0_i32_0 = arith.constant 0 : i32
    return %arg0, %c0_i32 : i32, i32
  }
  func.func @transform_1(%arg0: i32) -> (i32, i32) {
    %c0_i32 = arith.constant 0 : i32
    %c0_i32_0 = arith.constant 0 : i32
    %c0_i32_1 = arith.constant 0 : i32
    return %c0_i32, %c0_i32_0 : i32, i32
  }
  func.func @transform_2(%arg0: i32) -> (i32, i32) {
    %c0_i32 = arith.constant 0 : i32
    %c0_i32_0 = arith.constant 0 : i32
    %c0_i32_1 = arith.constant 0 : i32
    return %c0_i32, %c0_i32_0 : i32, i32
  }
  func.func @transform_3(%arg0: i32) -> (i32, i32) {
    %c0_i32 = arith.constant 0 : i32
    %c0_i32_0 = arith.constant 0 : i32
    %c0_i32_1 = arith.constant 0 : i32
    return %c0_i32, %c0_i32_0 : i32, i32
  }
  func.func @transform_4(%arg0: i32) -> (i32, i32) {
    %c0_i32 = arith.constant 0 : i32
    %c0_i32_0 = arith.constant 0 : i32
    %c0_i32_1 = arith.constant 0 : i32
    return %c0_i32, %c0_i32_0 : i32, i32
  }
  func.func @transform_5(%arg0: i32) -> (i32, i32) {
    %c0_i32 = arith.constant 0 : i32
    %c0_i32_0 = arith.constant 0 : i32
    %c0_i32_1 = arith.constant 0 : i32
    return %c0_i32, %c0_i32_0 : i32, i32
  }
  func.func @transform_6(%arg0: i32) -> (i32, i32) {
    %c0_i32 = arith.constant 0 : i32
    %c0_i32_0 = arith.constant 0 : i32
    %c0_i32_1 = arith.constant 0 : i32
    return %c0_i32, %c0_i32_0 : i32, i32
  }
  func.func @transform_7(%arg0: i32) -> (i32, i32) {
    %c0_i32 = arith.constant 0 : i32
    %c0_i32_0 = arith.constant 0 : i32
    return %arg0, %c0_i32 : i32, i32
  }
}

</mosaic_0001>

<bundles_post_ra>
// kernel: tpu_custom_call.1
= control target key start
LH: loop header
LB: loop body
LE: loop exit
PB: predicated region body
PF: predicated region fallthrough
CT: control target
= control target key end

     0   :  { %12 = vsyncpa [#allocation3], 0  ;;  %s1850_s0 = inlined_call_operand.hbm [shape: f32[8,24], index: 0, kind: input, shape index: {}]   ;;  %s1851_s1 = inlined_call_operand.hbm [shape: bf16[24,384], index: 1, kind: input, shape index: {}]   ;;  %s1852_s2 = inlined_call_operand.hbm [shape: bf16[384,384], index: 2, kind: input, shape index: {}]   ;;  %s1853_s3 = inlined_call_operand.hbm [shape: bf16[384,128], index: 3, kind: input, shape index: {}]   ;;  %s1854_s4 = inlined_call_operand.vmem [shape: f32[1,384], index: 4, kind: input, shape index: {}]   ;;  %s1855_s5 = inlined_call_operand.vmem [shape: f32[1,384], index: 5, kind: input, shape index: {}]   ;;  %s1856_s6 = inlined_call_operand.vmem [shape: f32[1,128], index: 6, kind: input, shape index: {}]   ;;  %s1857_s7 = inlined_call_operand.hbm [shape: f32[8,128], index: 7, kind: output, shape index: {}]  }
   0x1   :  { %13 = vsyncpa [#allocation6], 0 }
   0x2   :  { %14 = vsyncpa [#allocation9], 0 }
   0x3   :  { %15 = vsyncpa [#allocation4], 0  ;;  %s1675_s24 = smov [#allocation5]   ;;  %s1557_s28 = scalar_lea.hbm %s1851_s1, 576 }
   0x4   :  { %s31_s25 = sshll.u32 %s1675_s24, 4  ;;  %p1558_p0 = scmp.ne.s32.totalorder %s1851_s1, %s1557_s28  ;;  %s32_s25 = int_to_ptr.vmem [resolvable:$true] %s31_s25 }
   0x5   :  { %p1561_p1 = scmp.lt.u32.totalorder %s1557_s28, %s1851_s1 }
   0x7   :  { %p1563_p2 = pnand %p1561_p1, %p1558_p0 }
   0x9   :  { %1566 = shalt.err (!%p1563_p2)
}
   0xa   :  { %s1567_s10 = scalar_lea.vmem %s32_s25, 576  ;;  %p1572_p4 = scmp.lt.s32.totalorder %s32_s25, %s32_s25 }
   0xb   :  { %p1568_p3 = scmp.ne.s32.totalorder %s32_s25, %s1567_s10  ;;  %p1573_p5 = scmp.lt.s32.totalorder %s1567_s10, %s1567_s10 }
   0xd   :  { %p1574_p6 = por %p1573_p5, %p1572_p4 }
   0xf   :  { %p1575_p7 = pnand %p1574_p6, %p1568_p3 }
  0x11   :  { %1578 = shalt.err (!%p1575_p7)
}
  0x12   :  { %s1676_s11 = smov 192   ;;  %s1677_s12 = smov 12  }
  0x13   :  { %37 = dma.hbm_to_vmem [thread:$0]  %s1851_s1, 576, %s32_s25, [#allocation6], %s1676_s11, %s1676_s11, %s1677_s12  }
  0x14   :  { %s1678_s15 = smov [#allocation2]   ;;  %s1679_s17 = smov [#allocation7]  }
  0x15   :  { %s22_s16 = sshll.u32 %s1678_s15, 4  ;;  %s43_s18 = sshll.u32 %s1679_s17, 4  ;;  %s23_s16 = int_to_ptr.vmem [resolvable:$true] %s22_s16  ;;  %s44_s18 = int_to_ptr.vmem [resolvable:$true] %s43_s18 }
  0x16   :  { %s1579_s21 = scalar_lea.hbm %s1850_s0, 128 }
  0x17   :  { %p1580_p8 = scmp.ne.s32.totalorder %s1850_s0, %s1579_s21  ;;  %p1583_p9 = scmp.lt.u32.totalorder %s1579_s21, %s1850_s0 }
  0x19   :  { %p1585_p10 = pnand %p1583_p9, %p1580_p8 }
  0x1b   :  { %1588 = shalt.err (!%p1585_p10)
}
  0x1c   :  { %s1589_s1 = scalar_lea.vmem %s23_s16, 128  ;;  %p1594_p12 = scmp.lt.s32.totalorder %s23_s16, %s23_s16 }
  0x1d   :  { %p1590_p11 = scmp.ne.s32.totalorder %s23_s16, %s1589_s1  ;;  %p1595_p13 = scmp.lt.s32.totalorder %s1589_s1, %s1589_s1 }
  0x1f   :  { %p1596_p0 = por %p1595_p13, %p1594_p12 }
  0x21   :  { %p1597_p1 = pnand %p1596_p0, %p1590_p11 }
  0x23   :  { %1600 = shalt.err (!%p1597_p1)
}
  0x24   :  { %25 = dma.hbm_to_vmem [thread:$0]  %s1850_s0, 128, %s23_s16, [#allocation3]  }
  0x25   :  { %s1601_s30 = scalar_lea.hbm %s1852_s2, 9216 }
  0x26   :  { %p1602_p2 = scmp.ne.s32.totalorder %s1852_s2, %s1601_s30  ;;  %p1605_p3 = scmp.lt.u32.totalorder %s1601_s30, %s1852_s2 }
  0x28   :  { %p1607_p4 = pnand %p1605_p3, %p1602_p2 }
  0x2a   :  { %1610 = shalt.err (!%p1607_p4)
}
  0x2b   :  { %s1611_s14 = scalar_lea.vmem %s44_s18, 9216  ;;  %p1616_p6 = scmp.lt.s32.totalorder %s44_s18, %s44_s18 }
  0x2c   :  { %p1612_p5 = scmp.ne.s32.totalorder %s44_s18, %s1611_s14  ;;  %p1617_p7 = scmp.lt.s32.totalorder %s1611_s14, %s1611_s14 }
  0x2e   :  { %p1618_p8 = por %p1617_p7, %p1616_p6 }
  0x30   :  { %p1619_p9 = pnand %p1618_p8, %p1612_p5 }
  0x32   :  { %1622 = shalt.err (!%p1619_p9)
}
  0x33   :  { %49 = dma.hbm_to_vmem [thread:$0]  %s1852_s2, 9216, %s44_s18, [#allocation6], %s1676_s11, %s1676_s11, %s1677_s12  }
  0x34   :  { %s1680_s16 = smov [#allocation8]   ;;  %s1623_s21 = scalar_lea.hbm %s1853_s3, 3072 }
  0x35   :  { %s55_s17 = sshll.u32 %s1680_s16, 4  ;;  %p1624_p10 = scmp.ne.s32.totalorder %s1853_s3, %s1623_s21  ;;  %s56_s17 = int_to_ptr.vmem [resolvable:$true] %s55_s17 }
  0x36   :  { %p1627_p11 = scmp.lt.u32.totalorder %s1623_s21, %s1853_s3 }
  0x38   :  { %p1629_p12 = pnand %p1627_p11, %p1624_p10 }
  0x3a   :  { %1632 = shalt.err (!%p1629_p12)
}
  0x3b   :  { %s1633_s1 = scalar_lea.vmem %s56_s17, 3072  ;;  %p1638_p0 = scmp.lt.s32.totalorder %s56_s17, %s56_s17 }
  0x3c   :  { %p1634_p13 = scmp.ne.s32.totalorder %s56_s17, %s1633_s1  ;;  %p1639_p1 = scmp.lt.s32.totalorder %s1633_s1, %s1633_s1 }
  0x3e   :  { %p1640_p2 = por %p1639_p1, %p1638_p0 }
  0x40   :  { %p1641_p3 = pnand %p1640_p2, %p1634_p13 }
  0x42   :  { %1644 = shalt.err (!%p1641_p3)
}
  0x43   :  { %s1681_s2 = smov 64   ;;  %s1682_s11 = smov 4  }
  0x44   :  { %61 = dma.hbm_to_vmem [thread:$0]  %s1853_s3, 3072, %s56_s17, [#allocation9], %s1681_s2, %s1681_s2, %s1682_s11  }
  0x45   :  { %1667 = dma.done.wait [#allocation3], 128  }
  0x46   :  { %1668 = vsyncadd [#allocation3], 4294967168 }
  0x47   :  { %1669 = dma.done.wait [#allocation6], 9792  }
  0x48   :  { %1670 = vsyncadd [#allocation6], 4294957504 }
  0x49   :  { %1671 = dma.done.wait [#allocation9], 3072  }
  0x4a   :  { %1672 = vsyncadd [#allocation9], 4294964224  ;;  %v1683_v0 = vmov 0   ;;  %v1430_v1 = vld [vmem:[#allocation5 + $0x4] ss:$12 sps:$4 sm:$0xff]   ;;  %v87_v3 = vld [vmem:[#allocation5 + $0x18] sm:$0xff]  ;;  %v91_v62 = vlaneseq }
  0x4b   :  { %176 = vmatprep.mubr.bf16.mxu1 %v1683_v0  ;;  %v1432_v2 = vld [vmem:[#allocation5] ss:$12 sps:$4 sm:$0xff]   ;;  %vm134_vm0 = vcmask 1043456   ;;  %144 = vmatprep.subr.bf16.mxu1 %v1430_v1  ;;  %v1197_v4 = vcombine.high %v87_v3, %v87_v3  ;;  %v1196_v5 = vcombine.low %v87_v3, %v87_v3  ;;  %v81_v6 = vld [vmem:[#allocation2] sm:$0xff]  ;;  %v1437_v8 = vld [vmem:[#allocation7 + $0x4] ss:$12 sps:$4 sm:$0xff]  }
  0x4c   :  { %145 = vmatpush1.bf16.msra.mxu1 %v1432_v2  ;;  %v1439_v9 = vld [vmem:[#allocation7] ss:$12 sps:$4 sm:$0xff]   ;;  %v1440_v10 = vld [vmem:[#allocation7 + $0x1c] ss:$12 sps:$4 sm:$0xff]   ;;  %v82_v11 = vpack.c.bf16 %v81_v6, %v81_v6  ;;  %728 = vmatprep.subr.bf16.mxu0 %v1437_v8  ;;  %vm130_vm1 = vcmask 195584   ;;  %v1684_v13 = vmov 0.0  }
  0x4d   :  { %1199 = vmatprep.subr.msk.bf16.mxu1 %vm134_vm0, %v1197_v4  ;;  %v136_v7 = vsel %vm134_vm0, %v1196_v5, 0  ;;  %v1435_v12 = vld [vmem:[#allocation5 + $0x8] ss:$12 sps:$4 sm:$0xff]   ;;  %729 = vmatpush1.bf16.msra.mxu0 %v1439_v9  ;;  %v1436_v14 = vld [vmem:[#allocation5 + $0x20] ss:$0 sps:$4 sm:$0xff]   ;;  %vm1685_vm2 = vmmov 0  }
  0x4e   :  { %730 = vmatprep.subr.bf16.mxu0 %v1440_v10  ;;  %v1442_v15 = vld [vmem:[#allocation7 + $0x18] ss:$12 sps:$4 sm:$0xff]   ;;  %v1443_v16 = vld [vmem:[#allocation7 + $0x34] ss:$12 sps:$4 sm:$0xff]   ;;  %v142_v17 = vsel %vm134_vm0, %v1436_v14, 0  ;;  %v1792_v63 = vshrl.u32 %v91_v62, 7 }
  0x4f   :  { %v1445_v18 = vld [vmem:[#allocation7 + $0x30] ss:$12 sps:$4 sm:$0xff]   ;;  %v1446_v19 = vld [vmem:[#allocation7 + $0x4c] ss:$12 sps:$4 sm:$0xff]   ;;  %v1448_v20 = vld [vmem:[#allocation7 + $0x48] ss:$12 sps:$4 sm:$0xff]  }
  0x50   :  { %147 = vmatpush1.bf16.msra.mxu1 %v136_v7  ;;  %v1449_v21 = vld [vmem:[#allocation7 + $0x64] ss:$12 sps:$4 sm:$0xff]   ;;  %v1463_v22 = vld [vmem:[#allocation7 + $0xc8] ss:$12 sps:$4 sm:$0xff]   ;;  %v1451_v24 = vld [vmem:[#allocation7 + $0x60] ss:$12 sps:$4 sm:$0xff]  }
  0x51   :  { %1364 = vmatprep.subr.bf16.mxu1 %v1684_v13  ;;  %731 = vmatpush1.bf16.msra.mxu0 %v1442_v15  ;;  %v1465_v23 = vld [vmem:[#allocation7 + $0x8] ss:$12 sps:$4 sm:$0xff]   ;;  %v1468_v25 = vld [vmem:[#allocation7 + $0xe0] ss:$12 sps:$4 sm:$0xff]   ;;  %v1473_v28 = vld [vmem:[#allocation7 + $0xf8] ss:$12 sps:$4 sm:$0xff]  }
  0x52   :  { %732 = vmatprep.subr.bf16.mxu0 %v1443_v16  ;;  %v1470_v26 = vld [vmem:[#allocation7 + $0x20] ss:$12 sps:$4 sm:$0xff]   ;;  %v1452_v27 = vld [vmem:[#allocation7 + $0x7c] ss:$12 sps:$4 sm:$0xff]   ;;  %v1454_v29 = vld [vmem:[#allocation7 + $0x78] ss:$12 sps:$4 sm:$0xff]  }
  0x53   :  { %1200 = vmatmul.mubr.msk.bf16.vlgmr.msra.gmra.mrb[0].mxu1 %vm130_vm1, %v82_v11  ;;  %v1475_v30 = vld [vmem:[#allocation7 + $0x38] ss:$12 sps:$4 sm:$0xff]   ;;  %v1455_v31 = vld [vmem:[#allocation7 + $0x94] ss:$12 sps:$4 sm:$0xff]   ;;  %v1478_v32 = vld [vmem:[#allocation7 + $0x110] ss:$12 sps:$4 sm:$0xff]  }
  0x54   :  { %1365 = vmatpush3.bf16.msra.mxu1 %v1435_v12  ;;  %1368 = vmatprep.mubr.msk.bf16.mxu1 %vm1685_vm2, %v1684_v13  ;;  %v1480_v33 = vld [vmem:[#allocation7 + $0x50] ss:$12 sps:$4 sm:$0xff]   ;;  %v1458_v35 = vld [vmem:[#allocation7 + $0xac] ss:$12 sps:$4 sm:$0xff]   ;;  %v1483_v36 = vld [vmem:[#allocation7 + $0x128] ss:$12 sps:$4 sm:$0xff]  }
  0x55   :  { %1366 = vmatprep.subr.bf16.mxu1 %v1684_v13  ;;  %733 = vmatpush1.bf16.msra.mxu0 %v1445_v18  ;;  %v1457_v34 = vld [vmem:[#allocation7 + $0x90] ss:$12 sps:$4 sm:$0xff]   ;;  %v1460_v37 = vld [vmem:[#allocation7 + $0xa8] ss:$12 sps:$4 sm:$0xff]   ;;  %v1488_v39 = vld [vmem:[#allocation7 + $0x140] ss:$12 sps:$4 sm:$0xff]  }
  0x56   :  { %734 = vmatprep.subr.bf16.mxu0 %v1446_v19  ;;  %v1485_v38 = vld [vmem:[#allocation7 + $0x68] ss:$12 sps:$4 sm:$0xff]   ;;  %v1461_v40 = vld [vmem:[#allocation7 + $0xc4] ss:$12 sps:$4 sm:$0xff]   ;;  %v1464_v41 = vld [vmem:[#allocation7 + $0xc0] ss:$12 sps:$4 sm:$0xff]  }
  0x57   :  { %v1490_v42 = vld [vmem:[#allocation7 + $0x80] ss:$12 sps:$4 sm:$0xff]   ;;  %v1466_v43 = vld [vmem:[#allocation7 + $0xdc] ss:$12 sps:$4 sm:$0xff]   ;;  %v1469_v44 = vld [vmem:[#allocation7 + $0xd8] ss:$12 sps:$4 sm:$0xff]  }
  0x58   :  { %1367 = vmatpush3.bf16.msra.mxu1 %v142_v17  ;;  %v1471_v45 = vld [vmem:[#allocation7 + $0xf4] ss:$12 sps:$4 sm:$0xff]   ;;  %v1474_v46 = vld [vmem:[#allocation7 + $0xf0] ss:$12 sps:$4 sm:$0xff]   ;;  %v1476_v47 = vld [vmem:[#allocation7 + $0x10c] ss:$12 sps:$4 sm:$0xff]  }
  0x59   :  { %1302 = vmatprep.subr.bf16.mxu1 %v1463_v22  ;;  %735 = vmatpush1.bf16.msra.mxu0 %v1448_v20  ;;  %v1479_v48 = vld [vmem:[#allocation7 + $0x108] ss:$12 sps:$4 sm:$0xff]   ;;  %v1481_v49 = vld [vmem:[#allocation7 + $0x124] ss:$12 sps:$4 sm:$0xff]   ;;  %v1484_v50 = vld [vmem:[#allocation7 + $0x120] ss:$12 sps:$4 sm:$0xff]  }
  0x5a   :  { %736 = vmatprep.subr.bf16.mxu0 %v1449_v21  ;;  %v1486_v51 = vld [vmem:[#allocation7 + $0x13c] ss:$12 sps:$4 sm:$0xff]   ;;  %v1489_v52 = vld [vmem:[#allocation7 + $0x138] ss:$12 sps:$4 sm:$0xff]   ;;  %v1491_v53 = vld [vmem:[#allocation7 + $0x154] ss:$12 sps:$4 sm:$0xff]  }
  0x5b   :  { %1369 = vmatmul.mubr.msk.bf16.vlgmr.msra.gmra.mrb[4].mxu1 %vm130_vm1, %v82_v11  ;;  %v1493_v54 = vld [vmem:[#allocation7 + $0x158] ss:$12 sps:$4 sm:$0xff]   ;;  %v1494_v55 = vld [vmem:[#allocation7 + $0x150] ss:$12 sps:$4 sm:$0xff]   ;;  %v1499_v59 = vld [vmem:[#allocation7 + $0x168] ss:$12 sps:$4 sm:$0xff]  }
  0x5c   :  { %1303 = vmatpush3.bf16.msra.mxu1 %v1465_v23  ;;  %v1495_v56 = vld [vmem:[#allocation7 + $0x98] ss:$12 sps:$4 sm:$0xff]   ;;  %v1498_v58 = vld [vmem:[#allocation7 + $0x170] ss:$12 sps:$4 sm:$0xff]   ;;  %v93_v1 = vsub.s32 0, %v1792_v63  ;;  %v97_v3 = vsub.s32 1, %v1792_v63 }
  0x5d   :  { %1304 = vmatprep.subr.bf16.mxu1 %v1468_v25  ;;  %737 = vmatpush1.bf16.msra.mxu0 %v1451_v24  ;;  %v1496_v57 = vld [vmem:[#allocation7 + $0x16c] ss:$12 sps:$4 sm:$0xff]   ;;  %v1500_v60 = vld [vmem:[#allocation7 + $0xb0] ss:$12 sps:$4 sm:$0xff]   ;;  %v89_v2 = vld [vmem:[%s1854_s4] sm:$0x7] }
  0x5e   :  { %738 = vmatprep.subr.bf16.mxu0 %v1452_v27  ;;  %v1503_v61 = vld [vmem:[#allocation7 + $0x184] ss:$12 sps:$4 sm:$0xff]   ;;  %v94_v4 = vrot.slane %v89_v2, %v93_v1  ;;  %v98_v5 = vrot.slane %v89_v2, %v97_v3  ;;  %v1501_v16 = vld [vmem:[#allocation7 + $0x180] ss:$12 sps:$4 sm:$0xff]   ;;  %v1504_v17 = vld [vmem:[#allocation7 + $0x188] ss:$12 sps:$4 sm:$0xff]  }
  0x5f   :  { %v1507_v19 = vld [vmem:[#allocation7 + $0x19c] ss:$12 sps:$4 sm:$0xff]   ;;  %v1505_v22 = vld [vmem:[#allocation7 + $0x198] ss:$12 sps:$4 sm:$0xff]   ;;  %v1508_v23 = vld [vmem:[#allocation7 + $0x1a0] ss:$12 sps:$4 sm:$0xff]  }
  0x60   :  { %1305 = vmatpush3.bf16.msra.mxu1 %v1470_v26  ;;  %v1511_v25 = vld [vmem:[#allocation7 + $0x1b4] ss:$12 sps:$4 sm:$0xff]   ;;  %v1509_v27 = vld [vmem:[#allocation7 + $0x1b0] ss:$12 sps:$4 sm:$0xff]   ;;  %s1686_s29 = smov [#allocation10]  }
  0x61   :  { %1306 = vmatprep.subr.bf16.mxu1 %v1473_v28  ;;  %739 = vmatpush1.bf16.msra.mxu0 %v1454_v29  ;;  %v1512_v28 = vld [vmem:[#allocation7 + $0x1b8] ss:$12 sps:$4 sm:$0xff]   ;;  %s1182_s30 = sshll.u32 %s1686_s29, 4  ;;  %s1183_s30 = int_to_ptr.vmem [resolvable:$true] %s1182_s30 }
  0x62   :  { %740 = vmatprep.subr.bf16.mxu0 %v1455_v31  ;;  %v1515_v29 = vld [vmem:[#allocation7 + $0x1cc] ss:$12 sps:$4 sm:$0xff]   ;;  %v1516_v31 = vld [vmem:[#allocation7 + $0x1d0] ss:$12 sps:$4 sm:$0xff]   ;;  %v1547_v62 = vld [vmem:[#allocation8 + $0x20] sm:$0xff]   ;;  %s1645_s8 = scalar_lea.vmem %s1183_s30, 128  ;;  %p1650_p5 = scmp.lt.s32.totalorder %s1183_s30, %s1183_s30 }
  0x63   :  { %p1646_p4 = scmp.ne.s32.totalorder %s1183_s30, %s1645_s8  ;;  %p1651_p6 = scmp.lt.s32.totalorder %s1645_s8, %s1645_s8 }
  0x64   :  { %1307 = vmatpush3.bf16.msra.mxu1 %v1475_v30  ;;  %v1513_v30 = vld [vmem:[#allocation7 + $0x1c8] ss:$12 sps:$4 sm:$0xff]  }
  0x65   :  { %1308 = vmatprep.subr.bf16.mxu1 %v1478_v32  ;;  %741 = vmatpush1.bf16.msra.mxu0 %v1457_v34  ;;  %v1519_v32 = vld [vmem:[#allocation7 + $0x1e4] ss:$12 sps:$4 sm:$0xff]   ;;  %v1520_v34 = vld [vmem:[#allocation7 + $0x1e8] ss:$12 sps:$4 sm:$0xff]   ;;  %p1652_p7 = por %p1651_p6, %p1650_p5 }
  0x66   :  { %742 = vmatprep.subr.bf16.mxu0 %v1458_v35  ;;  %v1523_v35 = vld [vmem:[#allocation7 + $0x1fc] ss:$12 sps:$4 sm:$0xff]  }
  0x67   :  { %p1653_p8 = pnand %p1652_p7, %p1646_p4 }
  0x68   :  { %1309 = vmatpush3.bf16.msra.mxu1 %v1480_v33  ;;  %v1517_v33 = vld [vmem:[#allocation7 + $0x1e0] ss:$12 sps:$4 sm:$0xff]  }
  0x69   :  { %1310 = vmatprep.subr.bf16.mxu1 %v1483_v36  ;;  %743 = vmatpush1.bf16.msra.mxu0 %v1460_v37  ;;  %v1521_v37 = vld [vmem:[#allocation7 + $0x1f8] ss:$12 sps:$4 sm:$0xff]  }
  0x6a   :  { %744 = vmatprep.subr.bf16.mxu0 %v1461_v40 }
  0x6c   :  { %1311 = vmatpush3.bf16.msra.mxu1 %v1485_v38  ;;  %v1524_v38 = vld [vmem:[#allocation7 + $0x200] ss:$12 sps:$4 sm:$0xff]  }
  0x6d   :  { %1312 = vmatprep.subr.bf16.mxu1 %v1488_v39  ;;  %745 = vmatpush1.bf16.msra.mxu0 %v1464_v41  ;;  %v1527_v39 = vld [vmem:[#allocation7 + $0x214] ss:$12 sps:$4 sm:$0xff]   ;;  %v1525_v41 = vld [vmem:[#allocation7 + $0x210] ss:$12 sps:$4 sm:$0xff]  }
  0x6e   :  { %746 = vmatprep.subr.bf16.mxu0 %v1466_v43  ;;  %v1531_v43 = vld [vmem:[#allocation7 + $0x22c] ss:$12 sps:$4 sm:$0xff]  }
  0x70   :  { %1313 = vmatpush3.bf16.msra.mxu1 %v1490_v42  ;;  %v1528_v42 = vld [vmem:[#allocation7 + $0x218] ss:$12 sps:$4 sm:$0xff]  }
  0x71   :  { %747 = vmatpush1.bf16.msra.mxu0 %v1469_v44  ;;  %1314 = vmatprep.subr.bf16.mxu1 %v1493_v54  ;;  %v1540_v54 = vld [vmem:[#allocation8 + $0x50] sm:$0xff]  }
  0x72   :  { %748 = vmatprep.subr.bf16.mxu0 %v1471_v45  ;;  %v1529_v45 = vld [vmem:[#allocation7 + $0x228] ss:$12 sps:$4 sm:$0xff]  }
  0x74   :  { %1315 = vmatpush3.bf16.msra.mxu1 %v1495_v56  ;;  %v1541_v56 = vld [vmem:[#allocation8 + $0x10] sm:$0xff]  }
  0x75   :  { %749 = vmatpush1.bf16.msra.mxu0 %v1474_v46  ;;  %1316 = vmatprep.subr.bf16.mxu1 %v1498_v58  ;;  %v1532_v46 = vld [vmem:[#allocation7 + $0x230] ss:$12 sps:$4 sm:$0xff]  }
  0x76   :  { %750 = vmatprep.subr.bf16.mxu0 %v1476_v47  ;;  %v1542_v58 = vld [vmem:[#allocation8 + $0x98] sm:$0xff]  }
  0x78   :  { %1317 = vmatpush3.bf16.msra.mxu1 %v1500_v60  ;;  %v1546_v60 = vld [vmem:[#allocation8 + $0x60] sm:$0xff]  }
  0x79   :  { %751 = vmatpush1.bf16.msra.mxu0 %v1479_v48  ;;  %1372 = vmatprep.subr.bf16.mxu1 %v1684_v13  ;;  %v1533_v48 = vld [vmem:[#allocation8 + $0x80] sm:$0xff]  }
  0x7a   :  { %752 = vmatprep.subr.bf16.mxu0 %v1481_v49  ;;  %v1534_v49 = vld [vmem:[#allocation8 + $0x40] sm:$0xff]  }
  0x7d   :  { %753 = vmatpush1.bf16.msra.mxu0 %v1484_v50  ;;  %v1535_v50 = vld [vmem:[#allocation8] sm:$0xff]  }
  0x7e   :  { %754 = vmatprep.subr.bf16.mxu0 %v1486_v51  ;;  %v1537_v51 = vld [vmem:[#allocation8 + $0x48] sm:$0xff]  }
  0x81   :  { %755 = vmatpush1.bf16.msra.mxu0 %v1489_v52  ;;  %v1536_v52 = vld [vmem:[#allocation8 + $0x88] sm:$0xff]  }
  0x82   :  { %756 = vmatprep.subr.bf16.mxu0 %v1491_v53  ;;  %v1538_v53 = vld [vmem:[#allocation8 + $0x8] sm:$0xff]  }
  0x85   :  { %757 = vmatpush1.bf16.msra.mxu0 %v1494_v55  ;;  %v1539_v55 = vld [vmem:[#allocation8 + $0x90] sm:$0xff]  }
  0x86   :  { %758 = vmatprep.subr.bf16.mxu0 %v1496_v57  ;;  %v1543_v57 = vld [vmem:[#allocation8 + $0x58] sm:$0xff]  }
  0x89   :  { %759 = vmatpush1.bf16.msra.mxu0 %v1499_v59  ;;  %v1544_v59 = vld [vmem:[#allocation8 + $0x18] sm:$0xff]  }
  0x8a   :  { %769 = vmatprep.subr.bf16.mxu0 %v1503_v61  ;;  %v1545_v61 = vld [vmem:[#allocation8 + $0xa0] sm:$0xff]  }
 0x126   :  { %v178_v6 = vpop.f32.mrb[0].mxu1 }
 0x127   :  { %v179_v7 = vadd.f32 %v178_v6, %v94_v4  ;;  %v180_v8 = vpop.f32.mrb[1].mxu1  ;;  %v1548_v4 = vld [vmem:[#allocation8 + $0xa8] sm:$0xff]   ;;  %v1551_v6 = vld [vmem:[#allocation8 + $0xb0] sm:$0xff]  }
 0x128   :  { %v181_v9 = vadd.f32 %v180_v8, %v98_v5  ;;  %v182_v10 = vpop.f32.mrb[2].mxu1  ;;  %v1550_v5 = vld [vmem:[#allocation8 + $0x28] sm:$0xff]   ;;  %v1553_v8 = vld [vmem:[#allocation8 + $0x30] sm:$0xff]  }
 0x129   :  { %v225_v11 = vmax.f32 %v179_v7, 0.0  ;;  %v183_v12 = vpop.f32.mrb[3].mxu1  ;;  %v1552_v7 = vld [vmem:[#allocation8 + $0x70] sm:$0xff]   ;;  %v1555_v10 = vld [vmem:[#allocation8 + $0x78] sm:$0xff]  }
 0x12a   :  { %v226_v14 = vmax.f32 %v181_v9, 0.0  ;;  %v1554_v9 = vld [vmem:[#allocation8 + $0xb8] sm:$0xff]  }
 0x12b   :  { %v228_v18 = vpack.c.bf16 %v225_v11, %v225_v11  ;;  %v1556_v11 = vld [vmem:[#allocation8 + $0x38] sm:$0xff]  }
 0x12c   :  { %v229_v15 = vpack.c.bf16 %v226_v14, %v226_v14 }
 0x12e   :  { %760 = vmatprep.mubr.bf16.mxu0 %v229_v15  ;;  %842 = vmatprep.mubr.bf16.mxu1 %v229_v15  ;;  %v219_v20 = vpop.f32.mrb[4].mxu1 }
 0x12f   :  { %761 = vmatmul.mubr.bf16.vlgmr.msra.gmra.mrb[0].mxu0 %v228_v18  ;;  %843 = vmatmul.mubr.bf16.vlgmr.msra.gmra.mrb[8].mxu1 %v228_v18  ;;  %v1370_v21 = vpop.f32.mrb[5].mxu1  ;;  %v327_v18 = vld [vmem:[%s1855_s5] sm:$0x7] }
 0x130   :  { %770 = vmatpush1.bf16.msra.mxu0 %v1501_v16  ;;  %1373 = vmatpush3.bf16.msra.mxu1 %v1504_v17  ;;  %v222_v24 = vpop.f32.mrb[6].mxu1 }
 0x131   :  { %771 = vmatprep.subr.bf16.mxu0 %v1507_v19  ;;  %1374 = vmatprep.subr.bf16.mxu1 %v1684_v13  ;;  %v1371_v26 = vpop.f32.mrb[7].mxu1 }
 0x132   :  { %801 = vmatprep.mubr.bf16.mxu0 %v1683_v0  ;;  %1388 = vmatprep.mubr.msk.bf16.mxu1 %vm1685_vm2, %v1684_v13  ;;  %v101_v0 = vsub.s32 2, %v1792_v63 }
 0x134   :  { %772 = vmatpush1.bf16.msra.mxu0 %v1505_v22  ;;  %1375 = vmatpush3.bf16.msra.mxu1 %v1508_v23  ;;  %v102_v36 = vrot.slane %v89_v2, %v101_v0  ;;  %v1549_v2 = vld [vmem:[#allocation8 + $0x68] sm:$0xff]   ;;  %v340_v19 = vrot.slane %v327_v18, %v101_v0 }
 0x135   :  { %773 = vmatprep.subr.bf16.mxu0 %v1511_v25  ;;  %1376 = vmatprep.subr.bf16.mxu1 %v1684_v13 }
 0x136   :  { %v220_v40 = vadd.f32 %v219_v20, %v102_v36  ;;  %v336_v20 = vrot.slane %v327_v18, %v97_v3 }
 0x138   :  { %774 = vmatpush1.bf16.msra.mxu0 %v1509_v27  ;;  %1377 = vmatpush3.bf16.msra.mxu1 %v1512_v28  ;;  %v227_v44 = vmax.f32 %v220_v40, 0.0 }
 0x139   :  { %775 = vmatprep.subr.bf16.mxu0 %v1515_v29  ;;  %1378 = vmatprep.subr.bf16.mxu1 %v1684_v13 }
 0x13a   :  { %v230_v47 = vpack.c.bf16 %v227_v44, %v227_v44 }
 0x13c   :  { %776 = vmatpush1.bf16.msra.mxu0 %v1513_v30  ;;  %1379 = vmatpush3.bf16.msra.mxu1 %v1516_v31 }
 0x13d   :  { %777 = vmatprep.subr.bf16.mxu0 %v1519_v32  ;;  %1380 = vmatprep.subr.bf16.mxu1 %v1684_v13 }
 0x140   :  { %778 = vmatpush1.bf16.msra.mxu0 %v1517_v33  ;;  %1381 = vmatpush3.bf16.msra.mxu1 %v1520_v34 }
 0x141   :  { %779 = vmatprep.subr.bf16.mxu0 %v1523_v35  ;;  %1382 = vmatprep.subr.bf16.mxu1 %v1684_v13 }
 0x144   :  { %780 = vmatpush1.bf16.msra.mxu0 %v1521_v37  ;;  %1383 = vmatpush3.bf16.msra.mxu1 %v1524_v38 }
 0x145   :  { %781 = vmatprep.subr.bf16.mxu0 %v1527_v39  ;;  %1384 = vmatprep.subr.bf16.mxu1 %v1684_v13  ;;  %v1274_v39 = vld [vmem:[%s1856_s6] ss:$0 sm:$0xff] }
 0x148   :  { %782 = vmatpush1.bf16.msra.mxu0 %v1525_v41  ;;  %1385 = vmatpush3.bf16.msra.mxu1 %v1528_v42 }
 0x149   :  { %783 = vmatprep.subr.bf16.mxu0 %v1531_v43  ;;  %1386 = vmatprep.subr.bf16.mxu1 %v1684_v13 }
 0x14c   :  { %784 = vmatpush1.bf16.msra.mxu0 %v1529_v45  ;;  %1387 = vmatpush3.bf16.msra.mxu1 %v1532_v46 }
 0x14d   :  { %1392 = vmatprep.subr.bf16.mxu0 %v1684_v13  ;;  %1333 = vmatprep.subr.bf16.mxu1 %v1534_v49 }
 0x14f   :  { %802 = vmatmul.mubr.bf16.vlgmr.msra.gmra.mrb[0].mxu0 %v230_v47  ;;  %1389 = vmatmul.mubr.bf16.vlgmr.msra.gmra.mrb[12].mxu1 %v230_v47 }
 0x150   :  { %1408 = vmatprep.mubr.msk.bf16.mxu0 %vm1685_vm2, %v1684_v13  ;;  %1393 = vmatpush3.bf16.msra.mxu0 %v1533_v48 }
 0x151   :  { %1334 = vmatpush3.bf16.msra.mxu1 %v1535_v50  ;;  %1394 = vmatprep.subr.bf16.mxu0 %v1684_v13 }
 0x152   :  { %1335 = vmatprep.subr.bf16.mxu1 %v1537_v51 }
 0x154   :  { %1395 = vmatpush3.bf16.msra.mxu0 %v1536_v52 }
 0x155   :  { %1336 = vmatpush3.bf16.msra.mxu1 %v1538_v53  ;;  %1396 = vmatprep.subr.bf16.mxu0 %v1684_v13 }
 0x156   :  { %1337 = vmatprep.subr.bf16.mxu1 %v1540_v54 }
 0x158   :  { %1397 = vmatpush3.bf16.msra.mxu0 %v1539_v55 }
 0x159   :  { %1338 = vmatpush3.bf16.msra.mxu1 %v1541_v56  ;;  %1398 = vmatprep.subr.bf16.mxu0 %v1684_v13 }
 0x15a   :  { %1339 = vmatprep.subr.bf16.mxu1 %v1543_v57 }
 0x15c   :  { %1399 = vmatpush3.bf16.msra.mxu0 %v1542_v58 }
 0x15d   :  { %1340 = vmatpush3.bf16.msra.mxu1 %v1544_v59  ;;  %1400 = vmatprep.subr.bf16.mxu0 %v1684_v13 }
 0x15e   :  { %1341 = vmatprep.subr.bf16.mxu1 %v1546_v60 }
 0x160   :  { %1401 = vmatpush3.bf16.msra.mxu0 %v1545_v61 }
 0x161   :  { %1342 = vmatpush3.bf16.msra.mxu1 %v1547_v62  ;;  %1402 = vmatprep.subr.bf16.mxu0 %v1684_v13 }
 0x162   :  { %1343 = vmatprep.subr.bf16.mxu1 %v1549_v2 }
 0x164   :  { %1403 = vmatpush3.bf16.msra.mxu0 %v1548_v4 }
 0x165   :  { %1344 = vmatpush3.bf16.msra.mxu1 %v1550_v5  ;;  %1404 = vmatprep.subr.bf16.mxu0 %v1684_v13 }
 0x166   :  { %1345 = vmatprep.subr.bf16.mxu1 %v1552_v7 }
 0x168   :  { %1405 = vmatpush3.bf16.msra.mxu0 %v1551_v6 }
 0x169   :  { %1406 = vmatprep.subr.bf16.mxu0 %v1684_v13  ;;  %1346 = vmatpush3.bf16.msra.mxu1 %v1553_v8  ;;  %v332_v13 = vrot.slane %v327_v18, %v93_v1 }
 0x16a   :  { %1347 = vmatprep.subr.bf16.mxu1 %v1555_v10 }
 0x16c   :  { %1407 = vmatpush3.bf16.msra.mxu0 %v1554_v9 }
 0x16d   :  { %1348 = vmatpush3.bf16.msra.mxu1 %v1556_v11 }
 0x202   :  { %v1318_v12 = vpop.f32.mrb[8].mxu1 }
 0x203   :  { %v1319_v14 = vpop.f32.mrb[9].mxu1 }
 0x204   :  { %v1320_v15 = vadd.f32 %v1319_v14, %v1318_v12  ;;  %v1321_v16 = vpop.f32.mrb[10].mxu1 }
 0x205   :  { %v1322_v17 = vpop.f32.mrb[11].mxu1 }
 0x206   :  { %v845_v21 = vadd.f32 %v1320_v15, %v340_v19 }
 0x222   :  { %v803_v22 = vpop.f32.mrb[0].mxu0  ;;  %v884_v23 = vpop.f32.mrb[12].mxu1 }
 0x223   :  { %v1412_v24 = vadd.f32 %v803_v22, %v332_v13  ;;  %v885_v25 = vadd.f32 %v884_v23, %v845_v21  ;;  %v805_v26 = vpop.f32.mrb[1].mxu0  ;;  %v1390_v27 = vpop.f32.mrb[13].mxu1 }
 0x224   :  { %v1413_v28 = vadd.f32 %v805_v26, %v336_v20  ;;  %v807_v29 = vpop.f32.mrb[2].mxu0  ;;  %v887_v30 = vpop.f32.mrb[14].mxu1 }
 0x225   :  { %v890_v31 = vmax.f32 %v1412_v24, 0.0  ;;  %v892_v32 = vmax.f32 %v885_v25, 0.0  ;;  %v808_v33 = vpop.f32.mrb[3].mxu0  ;;  %v1391_v0 = vpop.f32.mrb[15].mxu1 }
 0x226   :  { %v891_v34 = vmax.f32 %v1413_v28, 0.0 }
 0x227   :  { %v895_v35 = vpack.c.bf16 %v892_v32, %v892_v32  ;;  %v893_v36 = vpack.c.bf16 %v890_v31, %v890_v31 }
 0x228   :  { %v894_v1 = vpack.c.bf16 %v891_v34, %v891_v34 }
 0x229   :  { %1409 = vmatmul.mubr.bf16.vlgmr.msra.gmra.mrb[4].mxu0 %v895_v35 }
 0x22a   :  { %1127 = vmatprep.mubr.bf16.mxu1 %v894_v1 }
 0x22b   :  { %1128 = vmatmul.mubr.bf16.vlgmr.msra.gmra.mrb[16].mxu1 %v893_v36 }
 0x2fc   :  { %v1169_v63 = vpop.f32.mrb[4].mxu0 }
 0x2fd   :  { %v1410_v3 = vpop.f32.mrb[5].mxu0 }
 0x2fe   :  { %v1349_v37 = vpop.f32.mrb[16].mxu1  ;;  %v1172_v38 = vpop.f32.mrb[6].mxu0 }
 0x2ff   :  { %v1350_v40 = vpop.f32.mrb[17].mxu1  ;;  %v1411_v41 = vpop.f32.mrb[7].mxu0 }
 0x300   :  { %v1351_v42 = vadd.f32 %v1350_v40, %v1349_v37  ;;  %v1352_v43 = vpop.f32.mrb[18].mxu1 }
 0x301   :  { %v1353_v44 = vpop.f32.mrb[19].mxu1 }
 0x302   :  { %v1130_v45 = vadd.f32 %v1351_v42, %v1274_v39 }
 0x304   :  { %v1170_v46 = vadd.f32 %v1169_v63, %v1130_v45 }
 0x306   :  { %1175 = vst [vmem:[#allocation10] sm:$0xff] %v1170_v46 }
 0x307   :  { %1656 = shalt.err (!%p1653_p8)
}
 0x308   :  { %s1657_s10 = scalar_lea.hbm %s1857_s7, 128 }
 0x309   :  { %p1658_p9 = scmp.ne.s32.totalorder %s1857_s7, %s1657_s10  ;;  %p1661_p10 = scmp.lt.u32.totalorder %s1657_s10, %s1857_s7 }
 0x30b   :  { %p1663_p11 = pnand %p1661_p10, %p1658_p9 }
 0x30d   :  { %1666 = shalt.err (!%p1663_p11)
}
 0x30e   :  { %1185 = dma.vmem_to_hbm [thread:$0]  %s1183_s30, 128, %s1857_s7, [#allocation4]  }
 0x30f   :  { %1673 = dma.done.wait [#allocation4], 128  }
 0x310   :  { %1674 = vsyncadd [#allocation4], 4294967168 }
 0x311   :  { %1189 = vsyncpa [#allocation3], 1 }
 0x312   :  { %1190 = vsyncpa [#allocation6], 1 }
 0x313   :  { %1191 = vsyncpa [#allocation9], 1 }
 0x314   :  { %1192 = vsyncpa [#allocation4], 1 }

</bundles_post_ra>
